<compile_context>
chip_gen: v6e
topology: v6e:2x2x1
jax: 0.10.0
libtpu: 0.0.40
codegen_flags: <defaults>
</compile_context>

<pallas_src>
import functools

import jax
import jax.numpy as jnp
from jax import lax
from jax.experimental import pallas as pl
from jax.experimental.pallas import tpu as pltpu

_MXU_MIN_C = 512  # below this, an (N<=8)-row matmul wastes the MXU; use VPU/XLU.


def _se_mlp(pooled, w1, w2, *, use_mxu):
    """pooled: (N, C) f32; w1: (Cr, C); w2: (C, Cr) -> sigmoid attention (N, C) f32."""
    w1 = w1.astype(jnp.float32)
    w2 = w2.astype(jnp.float32)
    if use_mxu:
        hidden = lax.dot_general(pooled, w1, (((1,), (1,)), ((), ())),
                                 preferred_element_type=jnp.float32)
        hidden = jnp.maximum(hidden, 0.0)
        logits = lax.dot_general(hidden, w2, (((1,), (1,)), ((), ())),
                                 preferred_element_type=jnp.float32)
    else:
        # Broadcast-multiply + lane (XLU) reduce: keeps the tiny MLP off the MXU
        # push/pop latency chain when C is small.
        hidden = jnp.sum(w1[None, :, :] * pooled[:, None, :], axis=-1)
        hidden = jnp.maximum(hidden, 0.0)
        logits = jnp.sum(w2[None, :, :] * hidden[:, None, :], axis=-1)
    return jax.nn.sigmoid(logits)


# --------------------------- single-pass fused path ---------------------------


def _lca_fused_kernel(x_ref, w1_ref, w2_ref, out_ref, *,
                      inv_hw, use_mxu, native_scale):
    # x_ref/out_ref: (TB, C, HW); w1_ref: (Cr, C); w2_ref: (C, Cr)
    # AdaptiveAvgPool2d(1): spatial mean, always in f32.
    pooled = jnp.sum(x_ref[...].astype(jnp.float32), axis=-1) * inv_hw   # (TB, C)
    attn = _se_mlp(pooled, w1_ref[...], w2_ref[...], use_mxu=use_mxu)    # (TB, C)
    if native_scale:
        # bf16 I/O: scale the dominant stream natively in bf16 (halves VALU ops
        # and vreg pressure on v6e/v7x; v5e lowers it via f32 internally).
        out_ref[...] = x_ref[...] * attn.astype(out_ref.dtype)[:, :, None]
    else:
        out_ref[...] = (x_ref[...].astype(jnp.float32)
                        * attn[:, :, None]).astype(out_ref.dtype)


# ------------------------ two-pass spatially-tiled path ------------------------


def _lca_pool_kernel(x_ref, w1_ref, w2_ref, attn_ref, *,
                     hw, hw_tile, inv_hw, mask_tail, use_mxu):
    # x_ref: (1, C, hw_tile); attn_ref (output, resident accumulator): (1, C, 1) f32
    j = pl.program_id(1)

    @pl.when(j == 0)
    def _():
        attn_ref[...] = jnp.zeros_like(attn_ref)

    x = x_ref[...].astype(jnp.float32)
    if mask_tail:
        # Last spatial tile may read out-of-bounds lanes; zero them so the
        # accumulated sum (and hence the mean) stays exact.
        col = lax.broadcasted_iota(jnp.int32, x.shape, 2) + j * hw_tile
        x = jnp.where(col < hw, x, 0.0)
    attn_ref[...] += jnp.sum(x, axis=-1, keepdims=True)                  # (1, C, 1)

    @pl.when(j == pl.num_programs(1) - 1)
    def _():
        pooled = attn_ref[...][:, :, 0] * inv_hw                          # (1, C)
        attn = _se_mlp(pooled, w1_ref[...], w2_ref[...], use_mxu=use_mxu)
        attn_ref[...] = attn[:, :, None]                                  # (1, C, 1)


def _lca_scale_kernel(attn_ref, x_ref, out_ref, *, native_scale):
    # attn_ref: (1, C, 1) f32; x_ref/out_ref: (1, C, hw_tile)
    if native_scale:
        out_ref[...] = x_ref[...] * attn_ref[...].astype(out_ref.dtype)
    else:
        out_ref[...] = (x_ref[...].astype(jnp.float32)
                        * attn_ref[...]).astype(out_ref.dtype)


# ----------------------------------- wrapper -----------------------------------


def _vmem_capacity_bytes():
    try:
        return int(pltpu.get_tpu_info().vmem_capacity_bytes)
    except Exception:
        return 64 * 1024 * 1024  # conservative: v7x per-TC VMEM


def light_channel_attention(x_nchw, w1, w2, *, block_budget_bytes=2 * 1024 * 1024):
    """x_nchw: (B, C, H, W); w1: (C//r, C); w2: (C, C//r). Returns (B, C, H, W)."""
    B, C, H, W = x_nchw.shape
    Cr = w1.shape[0]
    HW = H * W
    x_flat = x_nchw.reshape(B, C, HW)

    itemsize = jnp.dtype(x_flat.dtype).itemsize
    per_batch_bytes = C * HW * itemsize
    w_bytes = (w1.size * jnp.dtype(w1.dtype).itemsize
               + w2.size * jnp.dtype(w2.dtype).itemsize)
    inv_hw = float(1.0 / HW)
    use_mxu = C >= _MXU_MIN_C
    native_scale = x_flat.dtype == jnp.bfloat16   # pool/MLP/sigmoid always f32
    vmem_cap = _vmem_capacity_bytes()

    if per_batch_bytes <= block_budget_bytes:
        # ------------- fused single-pass: grid over batch blocks --------------
        # Cap TB so the grid keeps >= min(B, 8) steps: enables software
        # pipelining of the HBM streams and megacore sharding on v7x.
        target_steps = min(B, 8)
        tb_cap = max(1, B // target_steps)
        TB = 1
        for d in range(1, B + 1):
            if B % d == 0 and d <= tb_cap and d * per_batch_bytes <= block_budget_bytes:
                TB = d
        grid_b = B // TB

        block_bytes = TB * per_batch_bytes
        vmem_need = 4 * block_bytes + 4 * w_bytes + 2 * 1024 * 1024
        vmem_limit = int(min(max(vmem_need, 16 * 1024 * 1024), vmem_cap))

        cost = pl.CostEstimate(
            flops=2 * B * C * HW + 4 * B * C * Cr,
            transcendentals=B * C,
            bytes_accessed=2 * B * C * HW * itemsize + w_bytes,
        )
        kernel = functools.partial(_lca_fused_kernel, inv_hw=inv_hw,
                                   use_mxu=use_mxu, native_scale=native_scale)
        out_flat = pl.pallas_call(
            kernel,
            out_shape=jax.ShapeDtypeStruct((B, C, HW), x_flat.dtype),
            grid_spec=pltpu.PrefetchScalarGridSpec(
                num_scalar_prefetch=0,
                grid=(grid_b,),
                in_specs=[
                    pl.BlockSpec((TB, C, HW), lambda b: (b, 0, 0)),
                    pl.BlockSpec((Cr, C), lambda b: (0, 0)),
                    pl.BlockSpec((C, Cr), lambda b: (0, 0)),
                ],
                out_specs=pl.BlockSpec((TB, C, HW), lambda b: (b, 0, 0)),
            ),
            compiler_params=pltpu.CompilerParams(
                dimension_semantics=("parallel",),
                vmem_limit_bytes=vmem_limit,
            ),
            cost_estimate=cost,
        )(x_flat, w1, w2)
        return out_flat.reshape(B, C, H, W)

    # -------- two-pass: spatial tiling keeps block size independent of C*H*W --------
    hw_tile = (block_budget_bytes // (C * itemsize)) // 128 * 128
    hw_tile = max(128, hw_tile)
    if hw_tile >= HW:
        hw_tile = HW               # full-extent last dim is legal for any H*W
    n_hw = pl.cdiv(HW, hw_tile)
    mask_tail = (HW % hw_tile) != 0

    block_bytes = C * hw_tile * itemsize
    vmem_need = 4 * block_bytes + 4 * (w_bytes + C * 4) + 2 * 1024 * 1024
    vmem_limit = int(min(max(vmem_need, 16 * 1024 * 1024), vmem_cap))

    # Pass 1: pooled spatial sum accumulated in the resident (1, C, 1) output
    # block; SE MLP + sigmoid folded into the final spatial step.
    pool_cost = pl.CostEstimate(
        flops=B * C * HW + 4 * B * C * Cr,
        transcendentals=B * C,
        bytes_accessed=B * C * HW * itemsize + B * C * 4 + w_bytes,
    )
    pool_kernel = functools.partial(
        _lca_pool_kernel, hw=HW, hw_tile=hw_tile, inv_hw=inv_hw,
        mask_tail=mask_tail, use_mxu=use_mxu)
    attn = pl.pallas_call(
        pool_kernel,
        out_shape=jax.ShapeDtypeStruct((B, C, 1), jnp.float32),
        grid_spec=pltpu.PrefetchScalarGridSpec(
            num_scalar_prefetch=0,
            grid=(B, n_hw),
            in_specs=[
                pl.BlockSpec((1, C, hw_tile), lambda b, j: (b, 0, j)),
                pl.BlockSpec((Cr, C), lambda b, j: (0, 0)),
                pl.BlockSpec((C, Cr), lambda b, j: (0, 0)),
            ],
            out_specs=pl.BlockSpec((1, C, 1), lambda b, j: (b, 0, 0)),
        ),
        compiler_params=pltpu.CompilerParams(
            dimension_semantics=("parallel", "arbitrary"),
            vmem_limit_bytes=vmem_limit,
        ),
        cost_estimate=pool_cost,
    )(x_flat, w1, w2)

    # Pass 2: re-stream x and apply the per-channel sigmoid scale.
    scale_cost = pl.CostEstimate(
        flops=B * C * HW,
        transcendentals=0,
        bytes_accessed=2 * B * C * HW * itemsize + B * C * 4,
    )
    scale_kernel = functools.partial(_lca_scale_kernel, native_scale=native_scale)
    out_flat = pl.pallas_call(
        scale_kernel,
        out_shape=jax.ShapeDtypeStruct((B, C, HW), x_flat.dtype),
        grid_spec=pltpu.PrefetchScalarGridSpec(
            num_scalar_prefetch=0,
            grid=(B, n_hw),
            in_specs=[
                pl.BlockSpec((1, C, 1), lambda b, j: (b, 0, 0)),
                pl.BlockSpec((1, C, hw_tile), lambda b, j: (b, 0, j)),
            ],
            out_specs=pl.BlockSpec((1, C, hw_tile), lambda b, j: (b, 0, j)),
        ),
        compiler_params=pltpu.CompilerParams(
            dimension_semantics=("parallel", "parallel"),
            vmem_limit_bytes=vmem_limit,
        ),
        cost_estimate=scale_cost,
    )(attn, x_flat)
    return out_flat.reshape(B, C, H, W)


# ----------------------------------- test -----------------------------------


def _reference(x_nchw, w1, w2):
    # Pure-JAX reference mirroring the PyTorch forward.
    pooled = jnp.mean(x_nchw.astype(jnp.float32), axis=(2, 3))       # (B, C)
    hidden = jnp.maximum(pooled @ w1.T.astype(jnp.float32), 0.0)     # (B, Cr)
    attn = jax.nn.sigmoid(hidden @ w2.T.astype(jnp.float32))         # (B, C)
    return x_nchw.astype(jnp.float32) * attn[:, :, None, None]


if __name__ == "__main__":
    B, C, H, W = 2, 16, 16, 16
    reduction = 8
    Cr = C // reduction

    key = jax.random.PRNGKey(0)
    kx, k1, k2 = jax.random.split(key, 3)
    x = jax.random.normal(kx, (B, C, H, W), dtype=jnp.float32)
    # Deterministic init for the two bias-free 1x1 convs (weights squeezed to 2-D).
    w1 = jax.random.normal(k1, (Cr, C), dtype=jnp.float32) * 0.1
    w2 = jax.random.normal(k2, (C, Cr), dtype=jnp.float32) * 0.1

    ref = _reference(x, w1, w2)

    # 1) Fused single-pass path (multi-step batch grid), f32.
    out = jax.block_until_ready(light_channel_attention(x, w1, w2))
    assert out.shape == (B, C, H, W)
    assert jnp.allclose(out, ref, atol=1e-5, rtol=1e-5)

    # 2) bf16 I/O path (native bf16 broadcast-scale; pool/MLP/sigmoid stay f32).
    x_bf16 = x.astype(jnp.bfloat16)
    out_bf16 = jax.block_until_ready(light_channel_attention(x_bf16, w1, w2))
    ref_bf16 = _reference(x_bf16, w1, w2)
    assert out_bf16.dtype == jnp.bfloat16
    assert jnp.allclose(out_bf16.astype(jnp.float32), ref_bf16, atol=5e-2, rtol=5e-2)

    # 3) Force the two-pass spatially-tiled path with a tiny block budget
    #    (exercises the path used when C*H*W blocks don't fit VMEM).
    out_2p = jax.block_until_ready(
        light_channel_attention(x, w1, w2, block_budget_bytes=8 * 1024))
    assert jnp.allclose(out_2p, ref, atol=1e-5, rtol=1e-5)

    # 4) H*W not a multiple of 128: fused path (masked tail stores, no pad),
    #    and two-pass path (masked tail tile in the pooling reduction).
    x_odd = jax.random.normal(kx, (B, C, 12, 12), dtype=jnp.float32)
    ref_odd = _reference(x_odd, w1, w2)
    out_odd = jax.block_until_ready(light_channel_attention(x_odd, w1, w2))
    assert jnp.allclose(out_odd, ref_odd, atol=1e-5, rtol=1e-5)
    out_odd_2p = jax.block_until_ready(
        light_channel_attention(x_odd, w1, w2, block_budget_bytes=4 * 1024))
    assert jnp.allclose(out_odd_2p, ref_odd, atol=1e-5, rtol=1e-5)

    print("KERNEL_OK")
</pallas_src>

<mosaic_0001>
module attributes {stable_mosaic.version = 11 : i64} {
  func.func @_lca_fused_kernel(%arg0: i32, %arg1: memref<1x16x256xf32, #tpu.memory_space<vmem>>, %arg2: memref<2x16xf32, #tpu.memory_space<vmem>>, %arg3: memref<16x2xf32, #tpu.memory_space<vmem>>, %arg4: memref<1x16x256xf32, #tpu.memory_space<vmem>>) attributes {dimension_semantics = [#tpu.dimension_semantics<parallel>], iteration_bounds = array<i64: 2>, scalar_prefetch = 0 : i64, scratch_operands = 0 : i64, tpu.core_type = #tpu.core_type<tc>, window_params = [{transform_indices = @transform_0, window_bounds = array<i64: 1, 16, 256>}, {pipeline_mode = #tpu.pipeline_mode<synchronous>, transform_indices = @transform_1, window_bounds = array<i64: 2, 16>}, {pipeline_mode = #tpu.pipeline_mode<synchronous>, transform_indices = @transform_2, window_bounds = array<i64: 16, 2>}, {transform_indices = @transform_3, window_bounds = array<i64: 1, 16, 256>}]} {
    %c0 = arith.constant 0 : index
    %c0_0 = arith.constant 0 : index
    %c0_1 = arith.constant 0 : index
    %0 = vector.load %arg1[%c0, %c0_0, %c0_1] : memref<1x16x256xf32, #tpu.memory_space<vmem>>, vector<1x16x256xf32>
    %cst = arith.constant dense<0.000000e+00> : vector<1x16xf32>
    %1 = vector.multi_reduction <add>, %0, %cst [2] : vector<1x16x256xf32> to vector<1x16xf32>
    %cst_2 = arith.constant 3.906250e-03 : f32
    %2 = vector.broadcast %cst_2 : f32 to vector<1x16xf32>
    %3 = arith.mulf %1, %2 : vector<1x16xf32>
    %c0_3 = arith.constant 0 : index
    %c0_4 = arith.constant 0 : index
    %4 = vector.load %arg2[%c0_3, %c0_4] : memref<2x16xf32, #tpu.memory_space<vmem>>, vector<2x16xf32>
    %c0_5 = arith.constant 0 : index
    %c0_6 = arith.constant 0 : index
    %5 = vector.load %arg3[%c0_5, %c0_6] : memref<16x2xf32, #tpu.memory_space<vmem>>, vector<16x2xf32>
    %6 = vector.shape_cast %4 : vector<2x16xf32> to vector<1x2x16xf32>
    %7 = vector.shape_cast %3 : vector<1x16xf32> to vector<1x1x16xf32>
    %8 = vector.broadcast %7 : vector<1x1x16xf32> to vector<1x2x16xf32>
    %9 = arith.mulf %6, %8 : vector<1x2x16xf32>
    %cst_7 = arith.constant dense<0.000000e+00> : vector<1x2xf32>
    %10 = vector.multi_reduction <add>, %9, %cst_7 [2] : vector<1x2x16xf32> to vector<1x2xf32>
    %cst_8 = arith.constant 0.000000e+00 : f32
    %11 = vector.broadcast %cst_8 : f32 to vector<1x2xf32>
    %12 = arith.maximumf %10, %11 : vector<1x2xf32>
    %13 = vector.shape_cast %5 : vector<16x2xf32> to vector<1x16x2xf32>
    %14 = vector.shape_cast %12 : vector<1x2xf32> to vector<1x1x2xf32>
    %15 = vector.broadcast %14 : vector<1x1x2xf32> to vector<1x16x2xf32>
    %16 = arith.mulf %13, %15 : vector<1x16x2xf32>
    %cst_9 = arith.constant dense<0.000000e+00> : vector<1x16xf32>
    %17 = vector.multi_reduction <add>, %16, %cst_9 [2] : vector<1x16x2xf32> to vector<1x16xf32>
    %18 = arith.negf %17 : vector<1x16xf32>
    %19 = math.exp %18 : vector<1x16xf32>
    %cst_10 = arith.constant 1.000000e+00 : f32
    %20 = vector.broadcast %cst_10 : f32 to vector<1x16xf32>
    %21 = arith.addf %20, %19 : vector<1x16xf32>
    %22 = arith.divf %20, %21 : vector<1x16xf32>
    %c0_11 = arith.constant 0 : index
    %c0_12 = arith.constant 0 : index
    %c0_13 = arith.constant 0 : index
    %23 = vector.load %arg1[%c0_11, %c0_12, %c0_13] : memref<1x16x256xf32, #tpu.memory_space<vmem>>, vector<1x16x256xf32>
    %24 = vector.shape_cast %22 : vector<1x16xf32> to vector<1x16x1xf32>
    %25 = vector.broadcast %24 : vector<1x16x1xf32> to vector<1x16x256xf32>
    %26 = arith.mulf %23, %25 : vector<1x16x256xf32>
    %c0_14 = arith.constant 0 : index
    %c0_15 = arith.constant 0 : index
    %c0_16 = arith.constant 0 : index
    %27 = vector.load %arg4[%c0_14, %c0_15, %c0_16] : memref<1x16x256xf32, #tpu.memory_space<vmem>>, vector<1x16x256xf32>
    tpu.vector_store %arg4[%c0_14, %c0_15, %c0_16], %26 {strides = array<i32>} : memref<1x16x256xf32, #tpu.memory_space<vmem>>, vector<1x16x256xf32>,
    return
  }
  func.func @transform_0(%arg0: i32) -> (i32, i32, i32) {
    %c0_i32 = arith.constant 0 : i32
    %c0_i32_0 = arith.constant 0 : i32
    %c0_i32_1 = arith.constant 0 : i32
    return %arg0, %c0_i32, %c0_i32_0 : i32, i32, i32
  }
  func.func @transform_1(%arg0: i32) -> (i32, i32) {
    %c0_i32 = arith.constant 0 : i32
    %c0_i32_0 = arith.constant 0 : i32
    %c0_i32_1 = arith.constant 0 : i32
    return %c0_i32, %c0_i32_0 : i32, i32
  }
  func.func @transform_2(%arg0: i32) -> (i32, i32) {
    %c0_i32 = arith.constant 0 : i32
    %c0_i32_0 = arith.constant 0 : i32
    %c0_i32_1 = arith.constant 0 : i32
    return %c0_i32, %c0_i32_0 : i32, i32
  }
  func.func @transform_3(%arg0: i32) -> (i32, i32, i32) {
    %c0_i32 = arith.constant 0 : i32
    %c0_i32_0 = arith.constant 0 : i32
    %c0_i32_1 = arith.constant 0 : i32
    return %arg0, %c0_i32, %c0_i32_0 : i32, i32, i32
  }
}

</mosaic_0001>

<bundles_post_ra>
// kernel: tpu_custom_call.1
= control target key start
LH: loop header
LB: loop body
LE: loop exit
PB: predicated region body
PF: predicated region fallthrough
CT: control target
= control target key end

     0   :  { %8 = vsyncpa [#allocation3], 0  ;;  %s723_s0 = inlined_call_operand.hbm [shape: f32[2,16,256], index: 0, kind: input, shape index: {}]   ;;  %s724_s1 = inlined_call_operand.vmem [shape: f32[2,16], index: 1, kind: input, shape index: {}]   ;;  %s725_s2 = inlined_call_operand.vmem [shape: f32[16,2], index: 2, kind: input, shape index: {}]   ;;  %s726_s3 = inlined_call_operand.hbm [shape: f32[2,16,256], index: 3, kind: output, shape index: {}]  }
   0x1   :  { %10 = vsyncpa [#allocation3 + $0x1], 0 }
   0x2   :  { %11 = vsyncpa [#allocation4], 0 }
   0x3   :  { %13 = vsyncpa [#allocation4 + $0x1], 0  ;;  %s556_s12 = smov 0   ;;  %s558_s13 = smov 0  }
   0x4   :  { %s560_s14 = smov 0   ;;  %s562_s15 = smov 0  }
   0x5 LB: > { %s577_s16 = sadd.s32 4294967295, %s528_s15   ;;  %s360_s17 = sadd.s32 4294967294, %s528_s15   ;;  %s528_s15 = sphi %s562_s15, %s741_s15   ;;  %s524_s14 = sphi %s560_s14, %s740_s14   ;;  %s520_s13 = sphi %s558_s13, %s739_s13   ;;  %s516_s12 = sphi %s556_s12, %s738_s12  }
   0x6   : > { %s581_s18 = sadd.s32 1, %s528_s15   ;;  %s26_s19 = sadd.s32 1, %s524_s14 }
   0x7   : > { %s23_s20 = ssub.s32 %s528_s15, %s581_s18  ;;  %p33_p0 = scmp.ne.s32.totalorder %s524_s14, %s520_s13 }
   0x8   : > { %p24_p1 = scmp.eq.s32.totalorder %s23_s20, 0  ;;  %p34_p2 = scmp.eq.s32.totalorder %s528_s15, 0 }
   0x9   : > { %p39_p3 = scmp.ne.s32.totalorder %s520_s13, %s516_s12  ;;  %p40_p4 = scmp.eq.s32.totalorder %s577_s16, 0 }
   0xa   : > { %s593_s21 = scalar_select %p24_p1, %s524_s14, %s26_s19  }
   0xb   : > { %p595_p5 = por %p34_p2, %p33_p0  ;;  %p599_p6 = por %p40_p4, %p39_p3 }
   0xc   : > { %p105_p7 = scmp.eq.s32.totalorder %s577_s16, 1  ;;  %p111_p8 = scmp.eq.s32.totalorder %s360_s17, 1 }
   0xd   : > { %s730_s23 = scalar_select %p599_p6, 1, 0 }
   0xe   : > { %p390_p10 = scmp.lt.s32.totalorder %s528_s15, 2  ;;  %p606_p11 = por %p105_p7, %p33_p0 }
   0xf   : > { %p610_p12 = por %p111_p8, %p39_p3  ;;  %s137_s26 = sand.u32 1, %s524_s14  }
  0x10   : > { %s731_s24 = scalar_select %p606_p11, 1, 0 }
  0x11   : > { %s732_s25 = scalar_select %p610_p12, 1, 0 }
  0x12   : > { %s376_s27 = sshll.u32 %s528_s15, 9  ;;  %s363_s28 = sshll.u32 %s137_s26, 5 }
  0x13   : > { %s619_s4 = scalar_lea.hbm %s723_s0, %s376_s27  ;;  %s141_s5 = scalar_lea.vmem [#allocation2], %s363_s28 }
  0x14   : > { %s148_s6 = sshll.u32 %s141_s5, 4  ;;  %p623_p13 = pnand %p390_p10, %p595_p5  ;;  %s627_s6 = int_to_ptr.vmem [resolvable:$true] %s148_s6 }
  0x15   : > { %s629_s8 = scalar_lea.sflag [#allocation3], %s137_s26  ;;  %s436_s9 = scalar_lea.hbm %s619_s4, 512 }
  0x16   : > { %p437_p0 = scmp.ne.s32.totalorder %s619_s4, %s436_s9  ;;  %p438_p1 = pneg %p623_p13 }
  0x17   : > { %s441_s17 = scalar_lea.hbm %s723_s0, 1024  ;;  %p442_p4 = scmp.lt.s32.totalorder %s619_s4, %s723_s0 }
  0x18   : > { %p439_p2 = pnand %p438_p1, %p437_p0  ;;  %p443_p5 = scmp.lt.s32.totalorder %s441_s17, %s436_s9 }
  0x1a   : > { %p440_p3 = pneg %p439_p2  ;;  %p444_p7 = por %p443_p5, %p442_p4 }
  0x1c   : > { %p445_p8 = pnand %p444_p7, %p440_p3 }
  0x1e   : > { %448 = shalt.err (!%p445_p8)
}
  0x1f   : > { %s449_s22 = scalar_lea.vmem %s627_s6, 512  ;;  %s530_s26 = smov [#allocation2]  }
  0x20   : > { %p450_p10 = scmp.ne.s32.totalorder %s627_s6, %s449_s22  ;;  %s454_s27 = sshll.u32 %s530_s26, 4  ;;  %s455_s27 = int_to_ptr.vmem [resolvable:$false] %s454_s27 }
  0x21   : > { %s456_s28 = scalar_lea.vmem %s455_s27, 1024  ;;  %p457_p2 = scmp.lt.s32.totalorder %s627_s6, %s455_s27 }
  0x22   : > { %p452_p9 = pnand %p450_p10, %p438_p1  ;;  %p458_p12 = scmp.lt.s32.totalorder %s456_s28, %s449_s22 }
  0x24   : > { %p453_p0 = pneg %p452_p9  ;;  %p459_p11 = por %p458_p12, %p457_p2 }
  0x26   : > { %p460_p6 = pnand %p459_p11, %p453_p0 }
  0x28   : > { %463 = shalt.err (!%p460_p6)
}
  0x29   : > { %s531_s29 = smov 256   ;;  %s532_s30 = smov 16  }
  0x2a   : > { %385 = dma.hbm_to_vmem [thread:$0]  (!%p623_p13), %s619_s4, 512, %s627_s6, %s629_s8, %s531_s29, %s531_s29, %s532_s30  }
  0x2b   : > { %p366_p9 = scmp.ge.s32.totalorder %s528_s15, 1  ;;  %p156_p1 = scmp.lt.s32.totalorder %s528_s15, 3 }
  0x2d   : > { %p157_p3 = pnand %p366_p9, %p156_p1 }
  0x2e   : > { %s653_s5 = sand.u32 (!%p157_p3), 1, %s520_s13   ;;  %p734_p6 = scmp.ne.s32.totalorder (!%p157_p3), %s730_s23, 0 }
  0x2f   : > { %160 = sbr.rel (%p157_p3) target bundleno = 538 (0x21a), region = 32  ;;  %s367_s9 = sshll.u32 (!%p157_p3), %s653_s5, 5 }
  0x30   : > { %s163_s10 = scalar_lea.sflag (!%p157_p3), [#allocation3], %s653_s5  ;;  %s166_s11 = scalar_lea.vmem (!%p157_p3), [#allocation2], %s367_s9 }
  0x34   : > { %507 = dma.done.wait (%p734_p6), %s163_s10, 512  }
  0x35   : > { %509 = vsyncadd (%p734_p6), %s163_s10, 4294966784  ;;  %v189_v0 = vld [vmem:[%s166_s11] sm:$0xff]  ;;  %v190_v1 = vld [vmem:[%s166_s11 + $0x8] sm:$0xff]  ;;  %v206_v6 = vlaneseq  ;;  %vm217_vm0 = vcmask 130112   ;;  %vm221_vm1 = vcmask 123904   ;;  %vm246_vm2 = vcmask 15360  }
  0x36   : > { %v191_v2 = vld [vmem:[%s166_s11 + $0x10] sm:$0xff]  ;;  %v193_v3 = vadd.f32 %v190_v1, %v189_v0  ;;  %v192_v4 = vld [vmem:[%s166_s11 + $0x18] sm:$0xff]  ;;  %v201_v18 = vld [vmem:[%s724_s1] sm:$0x3]  ;;  %s377_s19 = sshll.u32 %s577_s16, 9  ;;  %s188_s20 = scalar_lea.vmem [#allocation5], %s367_s9 }
  0x37   : > { %v196_v5 = vadd.f32 %v192_v4, %v191_v2  ;;  %v207_v7 = vand.u32 127, %v206_v6  ;;  %v209_v8 = vshrl.u32 %v206_v6, 7  ;;  %v203_v24 = vld [vmem:[%s725_s2 + $0x8] sm:$0xff]  ;;  %v202_v25 = vld [vmem:[%s725_s2] sm:$0xff]  ;;  %s287_s22 = sshll.u32 %s188_s20, 4  ;;  %s678_s28 = scalar_lea.hbm %s726_s3, %s377_s19  ;;  %s680_s22 = int_to_ptr.vmem [resolvable:$true] %s287_s22 }
  0x38   : > { %194 = vadd.xlane.f32.xlu0 %v193_v3  ;;  %s274_s16 = scalar_lea.sflag [#allocation4], %s653_s5  ;;  %s464_s29 = scalar_lea.vmem %s680_s22, 512 }
  0x39   : > { %v212_v9 = vadd.s32 4294967288, %v207_v7  ;;  %v210_v11 = vsub.s32 %v207_v7, %v209_v8  ;;  %p465_p11 = scmp.ne.s32.totalorder %s680_s22, %s464_s29  ;;  %p735_p12 = scmp.ne.s32.totalorder %s731_s24, 0 }
  0x3a   : > { %s533_s30 = smov [#allocation5]  }
  0x3b   : > { %v215_v13 = vsub.s32 %v212_v9, %v209_v8  ;;  %p466_p13 = pnand %p465_p11, %p735_p12  ;;  %s468_s9 = sshll.u32 %s533_s30, 4  ;;  %s469_s9 = int_to_ptr.vmem [resolvable:$false] %s468_s9 }
  0x3c   : > { %197 = vadd.xlane.f32.xlu0 %v196_v5  ;;  %s470_s10 = scalar_lea.vmem %s469_s9, 1024  ;;  %p471_p5 = scmp.lt.s32.totalorder %s680_s22, %s469_s9 }
  0x3d   : > { %p467_p4 = pneg %p466_p13  ;;  %p472_p7 = scmp.lt.s32.totalorder %s470_s10, %s464_s29 }
  0x3f   : > { %p473_p8 = por %p472_p7, %p471_p5 }
  0x41   : > { %p474_p10 = pnand %p473_p8, %p467_p4 }
  0xc1   : > { %v195_v10 = vpop.xlane.xlu0 %194 }
  0xc2   : > { %v199_v12 = vmul.f32 0.00390625, %v195_v10 }
  0xc4   : > { %v211_v16 = vrot.slane %v199_v12, %v210_v11 }
  0xc5   : > { %v198_v14 = vpop.xlane.xlu0 %197 }
  0xc6   : > { %v200_v15 = vmul.f32 0.00390625, %v198_v14 }
  0xc8   : > { %v216_v17 = vrot.slane %v200_v15, %v215_v13 }
  0xca   : > { %v218_v19 = vsel %vm217_vm0, %v216_v17, %v211_v16 }
  0xcb   : > { %v220_v20 = vmul.f32 %v218_v19, %v201_v18 }
  0xcd   : > { %v222_v21 = vsel %vm221_vm1, %v220_v20, 0.0 }
  0xce   : > { %223 = vadd.xlane.f32.xlu1 %v222_v21 }
 0x157   : > { %v224_v22 = vpop.xlane.xlu1 %223 }
 0x158   : > { %v225_v23 = vmax.f32 %v224_v22, 0.0 }
 0x15a   : > { %v230_v26 = vrot.slane %v225_v23, %v210_v11 }
 0x15c   : > { %v245_v27 = vmul.f32 %v230_v26, %v203_v24  ;;  %v244_v28 = vmul.f32 %v230_v26, %v202_v25 }
 0x15e   : > { %v250_v29 = vsel %vm246_vm2, %v245_v27, 0.0  ;;  %v247_v30 = vsel %vm246_vm2, %v244_v28, 0.0 }
 0x15f   : > { %251 = vadd.xlane.f32.xlu0 %v250_v29  ;;  %248 = vadd.xlane.f32.xlu1 %v247_v30 }
 0x1e8   : > { %v252_v31 = vpop.xlane.xlu0 %251  ;;  %v249_v32 = vpop.xlane.xlu1 %248 }
 0x1e9   : > { %v370_v33 = vmul.f32 -1.442695, %v252_v31  ;;  %v369_v34 = vmul.f32 -1.442695, %v249_v32 }
 0x1eb   : > { %428 = vpow2.f32 %v370_v33 }
 0x1ec   : > { %430 = vpow2.f32 %v369_v34 }
 0x1f8   : > { %v429_v35 = vpop.eup %428 }
 0x1f9   : > { %v431_v36 = vpop.eup %430  ;;  %v260_v37 = vadd.f32 1.0, %v429_v35 }
 0x1fa   : > { %v259_v38 = vadd.f32 1.0, %v431_v36 }
 0x1fb   : > { %432 = vrcp.f32 %v260_v37 }
 0x1fc   : > { %434 = vrcp.f32 %v259_v38 }
 0x208   : > { %v433_v39 = vpop.eup %432 }
 0x209   : > { %v435_v40 = vpop.eup %434  ;;  %v267_v41 = vmul.f32 %v433_v39, %v191_v2  ;;  %v268_v42 = vmul.f32 %v433_v39, %v192_v4 }
 0x20a   : > { %v265_v43 = vmul.f32 %v435_v40, %v189_v0  ;;  %v266_v44 = vmul.f32 %v435_v40, %v190_v1 }
 0x20b   : > { %271 = vst [vmem:[%s188_s20 + $0x10] sm:$0xff] %v267_v41  ;;  %272 = vst [vmem:[%s188_s20 + $0x18] sm:$0xff] %v268_v42 }
 0x20c   : > { %269 = vst [vmem:[%s188_s20] sm:$0xff] %v265_v43  ;;  %270 = vst [vmem:[%s188_s20 + $0x8] sm:$0xff] %v266_v44 }
 0x20d   : > { %477 = shalt.err (!%p474_p10)
}
 0x20e   : > { %s478_s11 = scalar_lea.hbm %s678_s28, 512  ;;  %s482_s6 = scalar_lea.hbm %s726_s3, 1024 }
 0x20f   : > { %p479_p0 = scmp.ne.s32.totalorder %s678_s28, %s478_s11  ;;  %p483_p1 = scmp.lt.s32.totalorder %s678_s28, %s726_s3 }
 0x210   : > { %p484_p3 = scmp.lt.s32.totalorder %s482_s6, %s478_s11 }
 0x211   : > { %p480_p2 = pnand %p479_p0, %p735_p12 }
 0x212   : > { %p485_p6 = por %p484_p3, %p483_p1 }
 0x213   : > { %p481_p9 = pneg %p480_p2 }
 0x215   : > { %p486_p11 = pnand %p485_p6, %p481_p9 }
 0x217   : > { %489 = shalt.err (!%p486_p11)
}
 0x218   : > { %s534_s17 = smov 256   ;;  %s535_s19 = smov 16  }
 0x219   : > { %380 = dma.vmem_to_hbm [thread:$0]  (%p735_p12), %s680_s22, 512, %s678_s28, %s274_s16, %s534_s17, %s534_s17, %s535_s19  }
 0x21a PF: > { %s302_s20 = sand.u32 1, %s516_s12   ;;  %p736_p13 = scmp.ne.s32.totalorder %s732_s25, 0 }
 0x21b   : > { %p737_p4 = scmp.ge.s32.totalorder %s528_s15, 2  ;;  %s303_s26 = scalar_lea.sflag [#allocation4], %s302_s20 }
 0x21d   : > { %p387_p5 = pnand %p737_p4, %p736_p13 }
 0x21f   : > { %p388_p7 = pneg %p387_p5 }
 0x221   : > { %511 = dma.done.wait (%p388_p7), %s303_s26, 512  }
 0x222   : > { %513 = vsyncadd (%p388_p7), %s303_s26, 4294966784  ;;  %p16_p8 = scmp.ge.s32.totalorder %s581_s18, 4   ;;  %s738_s12 = smov %s520_s13 }
 0x223   : > { %s739_s13 = smov %s524_s14  ;;  %s740_s14 = smov %s593_s21 }
 0x224   : > { %s741_s15 = smov %s581_s18  ;;  %18 = sbr.rel (!%p16_p8) target bundleno = 5 (0x5), region = 77 }
 0x229   :  { %308 = vsyncpa [#allocation3], 1 }
 0x22a   :  { %310 = vsyncpa [#allocation3 + $0x1], 1 }
 0x22b   :  { %311 = vsyncpa [#allocation4], 1 }
 0x22c   :  { %313 = vsyncpa [#allocation4 + $0x1], 1 }

</bundles_post_ra>
